<compile_context>
chip_gen: v7x
topology: tpu7x:2x2x1
jax: 0.10.0
libtpu: 0.0.40
codegen_flags: <defaults>
</compile_context>

<pallas_src>
import jax
import jax.numpy as jnp
from jax import lax
from jax.experimental import pallas as pl
from jax.experimental.pallas import tpu as pltpu

_LANE_CANDIDATES = (1024, 512, 256, 128)
_MIB = 1024 * 1024


def _vmem_capacity_bytes():
    """Trace-time VMEM query; conservative fallback if unavailable."""
    try:
        cap = int(getattr(pltpu.get_tpu_info(), "vmem_capacity_bytes", 0))
        if cap > 0:
            return cap
    except Exception:
        pass
    return 64 * _MIB  # smallest current-gen per-TC VMEM (v7x)


def _make_kernel(valid_rows_last, needs_mask):
    """Per-block lane-wise partial sums of relu(x) - x*t + log1p(exp(-|x|))."""

    def kernel(x_ref, t_ref, partial_ref):
        # Cast in-kernel (inputs may be bf16 / other float dtypes).
        x = x_ref[...].astype(jnp.float32)
        t = t_ref[...].astype(jnp.float32)

        neg_abs = -jnp.abs(x)
        elem = jnp.maximum(x, 0.0) - x * t + jnp.log1p(jnp.exp(neg_abs))

        # Steady-state path: unmasked row reduction, lane-dense (1, L) output.
        partial_ref[...] = jnp.sum(elem, axis=0, keepdims=True)

        if needs_mask:
            # Only the last block can be row-ragged; keep the mask cost off the
            # steady-state loop by gating the masked recompute on program_id.
            @pl.when(pl.program_id(0) == pl.num_programs(0) - 1)
            def _():
                row = lax.broadcasted_iota(jnp.int32, elem.shape, 0)
                masked = jnp.where(row < valid_rows_last, elem, 0.0)
                partial_ref[...] = jnp.sum(masked, axis=0, keepdims=True)

    return kernel


def _elementwise_loss_sum(x, t):
    """Tiny pure-jnp path (flat tail / sub-128-element inputs)."""
    x = x.astype(jnp.float32)
    t = t.astype(jnp.float32)
    return jnp.sum(jnp.maximum(x, 0.0) - x * t + jnp.log1p(jnp.exp(-jnp.abs(x))))


@jax.jit
def stable_bce_loss(inputs, targets):
    """Matches StableBCELoss.forward: mean of the stable BCE-with-logits."""
    n = inputs.size
    x = inputs.reshape(-1)
    t = targets.reshape(-1)

    # Lane width: largest candidate that still gives >= 8 sublane rows.
    lane_width = None
    for c in _LANE_CANDIDATES:
        if n // c >= 8:
            lane_width = c
            break
    if lane_width is None and n >= 128:
        lane_width = 128
    if lane_width is None:
        # Tiny input (< 128 elements): a kernel launch is not worth it.
        return _elementwise_loss_sum(x, t) / n

    rows = n // lane_width
    body_n = rows * lane_width
    tail = n - body_n  # < lane_width elements, summed wrapper-side (no pad copy)

    x_body = x[:body_n].reshape(rows, lane_width)
    t_body = t[:body_n].reshape(rows, lane_width)
    # TODO(synk): in the ragged case the body slice may still materialize a
    # copy; a manual-DMA tail block (memory_space=pl.ANY) would avoid it.

    # Byte-based, generation-aware block sizing: ~half of VMEM for the
    # 2-input x 2-buffer pipeline, capped so v7x (64 MiB VMEM) stays safe.
    cap = _vmem_capacity_bytes()
    pipeline_budget = min(cap // 2, 32 * _MIB)
    bytes_per_elem_per_step = 2 * (x.dtype.itemsize + t.dtype.itemsize)
    block_elems = max(8 * lane_width, pipeline_budget // bytes_per_elem_per_step)
    target_rows = max(8, block_elems // lane_width)

    if rows <= target_rows:
        block_rows = rows  # single full-extent block; always legal
    else:
        block_rows = max(16, (target_rows // 16) * 16)  # sublane-aligned (bf16-safe)

    num_blocks = pl.cdiv(rows, block_rows)

    # v7x megacore: best-effort even block count so the "parallel" axis splits
    # evenly across 2 TensorCores (no effect on 1-TC v5e/v6e).
    if num_blocks > 1 and num_blocks % 2 == 1:
        for nb in (num_blocks + 1, num_blocks + 3):
            br = max(16, ((-(-rows // nb) + 15) // 16) * 16)
            if pl.cdiv(rows, br) % 2 == 0:
                block_rows = br
                num_blocks = pl.cdiv(rows, br)
                break

    needs_mask = (num_blocks * block_rows) != rows
    valid_rows_last = rows - (num_blocks - 1) * block_rows

    vmem_limit = int(min(cap * 3 // 4, 48 * _MIB))

    kernel = _make_kernel(valid_rows_last, needs_mask)

    partials = pl.pallas_call(
        kernel,
        out_shape=jax.ShapeDtypeStruct((num_blocks, lane_width), jnp.float32),
        grid=(num_blocks,),
        in_specs=[
            pl.BlockSpec((block_rows, lane_width), lambda i: (i, 0)),
            pl.BlockSpec((block_rows, lane_width), lambda i: (i, 0)),
        ],
        out_specs=pl.BlockSpec((1, lane_width), lambda i: (i, 0)),
        compiler_params=pltpu.CompilerParams(
            dimension_semantics=("parallel",),
            vmem_limit_bytes=vmem_limit,
        ),
    )(x_body, t_body)

    total = jnp.sum(partials)
    if tail > 0:
        total = total + _elementwise_loss_sum(x[body_n:], t[body_n:])
    return total / n


def _stable_bce_ref(inputs, targets):
    """Pure-JAX reference mirroring the torch code."""
    x = inputs.reshape(-1).astype(jnp.float32)
    t = targets.reshape(-1).astype(jnp.float32)
    neg_abs = -jnp.abs(x)
    loss = jnp.maximum(x, 0.0) - x * t + jnp.log(1.0 + jnp.exp(neg_abs))
    return loss.mean()


if __name__ == "__main__":
    key = jax.random.PRNGKey(0)
    k1, k2 = jax.random.split(key)

    # Small NCHW shapes: batch=2, channels=4, spatial=16x16.
    # Logits in bf16 exercise the in-kernel cast; targets are float {0,1}.
    logits = jax.random.normal(k1, (2, 4, 16, 16), dtype=jnp.float32).astype(
        jnp.bfloat16
    )
    targets = (jax.random.uniform(k2, (2, 4, 16, 16)) > 0.5).astype(jnp.float32)

    loss = stable_bce_loss(logits, targets)
    loss = jax.block_until_ready(loss)

    ref = _stable_bce_ref(logits, targets)
    assert jnp.allclose(loss, ref, atol=1e-4, rtol=1e-4), (loss, ref)

    print("KERNEL_OK")
</pallas_src>

<mosaic_0001>
module attributes {stable_mosaic.version = 11 : i64} {
  func.func @kernel(%arg0: i32, %arg1: memref<8x256xbf16, #tpu.memory_space<vmem>>, %arg2: memref<8x256xf32, #tpu.memory_space<vmem>>, %arg3: memref<1x256xf32, #tpu.memory_space<vmem>>) attributes {dimension_semantics = [#tpu.dimension_semantics<parallel>], iteration_bounds = array<i64: 1>, scalar_prefetch = 0 : i64, scratch_operands = 0 : i64, tpu.core_type = #tpu.core_type<tc>, window_params = [{transform_indices = @transform_0, window_bounds = array<i64: 8, 256>}, {transform_indices = @transform_1, window_bounds = array<i64: 8, 256>}, {transform_indices = @transform_2, window_bounds = array<i64: 1, 256>}]} {
    %c0 = arith.constant 0 : index
    %c0_0 = arith.constant 0 : index
    %0 = vector.load %arg1[%c0, %c0_0] : memref<8x256xbf16, #tpu.memory_space<vmem>>, vector<8x256xbf16>
    %1 = arith.extf %0 : vector<8x256xbf16> to vector<8x256xf32>
    %c0_1 = arith.constant 0 : index
    %c0_2 = arith.constant 0 : index
    %2 = vector.load %arg2[%c0_1, %c0_2] : memref<8x256xf32, #tpu.memory_space<vmem>>, vector<8x256xf32>
    %3 = math.absf %1 : vector<8x256xf32>
    %cst = arith.constant 0.000000e+00 : f32
    %4 = vector.broadcast %cst : f32 to vector<8x256xf32>
    %5 = arith.subf %4, %3 : vector<8x256xf32>
    %cst_3 = arith.constant 0.000000e+00 : f32
    %6 = vector.broadcast %cst_3 : f32 to vector<8x256xf32>
    %7 = arith.maximumf %1, %6 : vector<8x256xf32>
    %8 = arith.mulf %1, %2 : vector<8x256xf32>
    %9 = arith.subf %7, %8 : vector<8x256xf32>
    %10 = math.exp %5 : vector<8x256xf32>
    %11 = math.log1p %10 : vector<8x256xf32>
    %12 = arith.addf %9, %11 : vector<8x256xf32>
    %cst_4 = arith.constant dense<0.000000e+00> : vector<256xf32>
    %13 = vector.multi_reduction <add>, %12, %cst_4 [0] : vector<8x256xf32> to vector<256xf32>
    %14 = vector.shape_cast %13 : vector<256xf32> to vector<1x256xf32>
    %c0_5 = arith.constant 0 : index
    %c0_6 = arith.constant 0 : index
    %15 = vector.load %arg3[%c0_5, %c0_6] : memref<1x256xf32, #tpu.memory_space<vmem>>, vector<1x256xf32>
    tpu.vector_store %arg3[%c0_5, %c0_6], %14 {strides = array<i32>} : memref<1x256xf32, #tpu.memory_space<vmem>>, vector<1x256xf32>,
    return
  }
  func.func @transform_0(%arg0: i32) -> (i32, i32) {
    %c0_i32 = arith.constant 0 : i32
    %c0_i32_0 = arith.constant 0 : i32
    return %arg0, %c0_i32 : i32, i32
  }
  func.func @transform_1(%arg0: i32) -> (i32, i32) {
    %c0_i32 = arith.constant 0 : i32
    %c0_i32_0 = arith.constant 0 : i32
    return %arg0, %c0_i32 : i32, i32
  }
  func.func @transform_2(%arg0: i32) -> (i32, i32) {
    %c0_i32 = arith.constant 0 : i32
    %c0_i32_0 = arith.constant 0 : i32
    return %arg0, %c0_i32 : i32, i32
  }
}

</mosaic_0001>

<bundles_post_ra>
// kernel: stable_bce_loss.1
= control target key start
LH: loop header
LB: loop body
LE: loop exit
PB: predicated region body
PF: predicated region fallthrough
CT: control target
= control target key end

     0   :  { %v98_v41 = vmov 1966171168   ;;  %v68_v43 = vlaneseq  ;;  %s126_s0 = inlined_call_operand.vmem [shape: bf16[8,256], index: 0, kind: input, shape index: {}]   ;;  %s127_s1 = inlined_call_operand.vmem [shape: f32[8,256], index: 1, kind: input, shape index: {}]   ;;  %s128_s2 = inlined_call_operand.vmem [shape: f32[1,256], index: 2, kind: output, shape index: {}]  }
   0x1   :  { %v11_v0 = vld [vmem:[%s126_s0] sm:$0xff]  ;;  %v15_v16 = vld [vmem:[%s127_s1 + $0x8] sm:$0xff]  ;;  %v66_v42 = vunpack.c.l.s4 %v98_v41 }
   0x2   :  { %v12_v1 = vunpack.c.l.bf16 %v11_v0  ;;  %v13_v2 = vunpack.c.h.bf16 %v11_v0  ;;  %v14_v15 = vld [vmem:[%s127_s1] sm:$0xff]  ;;  %v69_v49 = vshrl.u32 %v68_v43, 7  ;;  %vm82_vm2 = vcmp.lt.s32.totalorder %v68_v43, 256 }
   0x3   :  { %v67_v48 = vunpack.c.0.s8 %v66_v42 }
   0x4   :  { %v16_v3 = vand.u32 2147483647, %v12_v1  ;;  %v17_v4 = vand.u32 2147483647, %v13_v2  ;;  %v20_v18 = vmax.f32 %v12_v1, 0.0  ;;  %v22_v19 = vmul.f32 %v14_v15, %v12_v1 }
   0x5   :  { %v21_v22 = vmax.f32 %v13_v2, 0.0  ;;  %v23_v23 = vmul.f32 %v15_v16, %v13_v2  ;;  %v70_v54 = vsub.s32 %v67_v48, %v69_v49 }
   0x6   :  { %v18_v5 = vsub.f32 0.0, %v16_v3  ;;  %v19_v6 = vsub.f32 0.0, %v17_v4  ;;  %v24_v27 = vsub.f32 %v20_v18, %v22_v19 }
   0x7   :  { %v25_v30 = vsub.f32 %v21_v22, %v23_v23 }
   0x8   :  { %v26_v7 = vmul.f32 1.442695, %v18_v5  ;;  %v28_v8 = vmul.f32 1.442695, %v19_v6 }
   0xa   :  { %90 = vpow2.f32 %v26_v7 }
   0xb   :  { %92 = vpow2.f32 %v28_v8 }
  0x14   :  { %v91_v9 = vpop.eup %90 }
  0x15   :  { %v93_v10 = vpop.eup %92  ;;  %v30_v11 = vadd.f32 1.0, %v91_v9  ;;  %v33_v13 = vmul.f32 -0.5, %v91_v9  ;;  %v36_v20 = vand.u32 2147483647, %v91_v9 }
  0x16   :  { %v39_v12 = vadd.f32 1.0, %v93_v10  ;;  %v42_v14 = vmul.f32 -0.5, %v93_v10  ;;  %v45_v24 = vand.u32 2147483647, %v93_v10 }
  0x17   :  { %94 = vlog2.f32 %v30_v11  ;;  %v34_v17 = vadd.f32 1.0, %v33_v13  ;;  %vm37_vm0 = vcmp.lt.f32.partialorder %v36_v20, 0.0004427343 }
  0x18   :  { %96 = vlog2.f32 %v39_v12  ;;  %v43_v21 = vadd.f32 1.0, %v42_v14  ;;  %vm46_vm1 = vcmp.lt.f32.partialorder %v45_v24, 0.0004427343 }
  0x19   :  { %v35_v25 = vmul.f32 %v91_v9, %v34_v17 }
  0x1a   :  { %v44_v28 = vmul.f32 %v93_v10, %v43_v21 }
  0x21   :  { %v95_v26 = vpop.eup %94 }
  0x22   :  { %v97_v29 = vpop.eup %96  ;;  %v32_v31 = vmul.f32 0.6931472, %v95_v26 }
  0x23   :  { %v41_v32 = vmul.f32 0.6931472, %v97_v29 }
  0x24   :  { %v38_v33 = vsel %vm37_vm0, %v35_v25, %v32_v31 }
  0x25   :  { %v47_v34 = vsel %vm46_vm1, %v44_v28, %v41_v32  ;;  %v48_v35 = vadd.f32 %v38_v33, %v24_v27 }
  0x26   :  { %v49_v36 = vadd.f32 %v47_v34, %v25_v30 }
  0x27   :  { %v50_v37 = vrot.slane %v48_v35, 4 }
  0x28   :  { %v56_v38 = vrot.slane %v49_v36, 4 }
  0x29   :  { %v51_v39 = vadd.f32 %v50_v37, %v48_v35 }
  0x2a   :  { %v57_v40 = vadd.f32 %v56_v38, %v49_v36 }
  0x2b   :  { %v52_v44 = vrot.slane %v51_v39, 2 }
  0x2c   :  { %v58_v45 = vrot.slane %v57_v40, 2 }
  0x2d   :  { %v53_v46 = vadd.f32 %v52_v44, %v51_v39 }
  0x2e   :  { %v59_v47 = vadd.f32 %v58_v45, %v57_v40 }
  0x2f   :  { %v54_v50 = vrot.slane %v53_v46, 1 }
  0x30   :  { %v60_v51 = vrot.slane %v59_v47, 1 }
  0x31   :  { %v55_v52 = vadd.f32 %v54_v50, %v53_v46 }
  0x32   :  { %v61_v53 = vadd.f32 %v60_v51, %v59_v47 }
  0x34   :  { %v64_v55 = vcombine.low %v55_v52, %v61_v53 }
  0x36   :  { %v71_v56 = vrot.slane %v64_v55, %v70_v54 }
  0x38   :  { %v78_v57 = vrot.slane %v71_v56, %v70_v54 }
  0x3a   :  { %84 = vst.msk [vmem:[%s128_s2] sm:$0x3] %vm82_vm2, %v78_v57 }

</bundles_post_ra>
